<compile_context>
chip_gen: v6e
topology: v6e:2x2x1
jax: 0.10.0
libtpu: 0.0.40
codegen_flags: <defaults>
</compile_context>

<pallas_src>
import functools

import jax
import jax.numpy as jnp
from jax import lax
from jax.experimental import pallas as pl
from jax.experimental.pallas import tpu as pltpu


def _round_up(x, m):
    return ((x + m - 1) // m) * m


def _pick_tiles(n, d_pad, elem_bytes):
    """Pick (block_q, block_k, n_pad) under (8,128) layout rules + VMEM budget."""
    if n <= 512:
        # Small problems: a single column block, but >= 2 row blocks so both
        # v7x TensorCores get work on the "parallel" row axis.
        n_pad = _round_up(n, 128)
        tk = n_pad
        tq = max(8, n_pad // 2)
        return tq, tk, n_pad
    tq = 256
    n_r = _round_up(n, tq)
    # Double-buffered feature tiles + ~4 f32 [tq, tk] temporaries must stay
    # under a budget that is safe on v7x (64 MiB physical VMEM; we request a
    # 48 MiB scoped limit below, so budget leaves headroom).
    budget = 36 * 1024 * 1024
    tk = 256
    for cand in (2048, 1024, 512, 256):
        if cand > n_r:
            continue
        need = 2 * (tq + cand) * d_pad * elem_bytes + 4 * tq * cand * 4
        if need <= budget:
            tk = cand
            break
    n_pad = _round_up(n, tk)  # tq (256) divides every tk candidate
    return tq, tk, n_pad


def _supcon_kernel(q_ref, kt_ref, lab_q_ref, lab_k_ref, pc_ref, out_ref,
                   *scratch, assume_normalized, const_m, neg_scale,
                   block_q, block_k, n_valid, n_pad):
    # q_ref     : [block_q, D]  anchor rows, pre-scaled by 1/temperature
    # kt_ref    : [D, block_k]  contrast columns (pre-transposed, unscaled)
    # lab_q_ref : [block_q, 1]  int32 group id per anchor row (-1 for padding)
    # lab_k_ref : [1, block_k]  int32 group id per contrast col (-2 for padding)
    # pc_ref    : [block_q, 1]  f32 positive count per anchor (0 for padding)
    # out_ref   : [block_q, 1]  per-anchor loss, written on the last col block
    if assume_normalized:
        l_sc, ps_sc = scratch
    else:
        m_sc, l_sc, ps_sc = scratch

    i = pl.program_id(0)             # row block ("parallel")
    j = pl.program_id(1)             # column / reduction block ("arbitrary")
    last_j = pl.num_programs(1) - 1

    @pl.when(j == 0)
    def _init():
        if not assume_normalized:
            m_sc[...] = jnp.full((block_q, 1), -jnp.inf, jnp.float32)
        l_sc[...] = jnp.zeros((block_q, 1), jnp.float32)
        ps_sc[...] = jnp.zeros((block_q, 1), jnp.float32)

    # Plain (M,K)x(K,N) MXU matmul with f32 accumulation; no in-kernel
    # transpose and no per-element temperature multiply (folded into Q).
    s = lax.dot_general(
        q_ref[...], kt_ref[...],
        dimension_numbers=(((1,), (0,)), ((), ())),
        preferred_element_type=jnp.float32,
    )                                                        # [bq, bk] f32

    if assume_normalized:
        # |s| <= 1/temperature for unit-norm features -> constant stabilizer.
        m_b = const_m
    else:
        # Online running max.  The unmasked max may include diagonal / padded
        # entries; any finite stabilizer cancels exactly in m + log(l).
        m_prev = m_sc[...]
        m_new = jnp.maximum(m_prev, jnp.max(s, axis=1, keepdims=True))
        l_sc[...] = jnp.exp(m_prev - m_new) * l_sc[...]
        m_sc[...] = m_new
        m_b = m_new

    # Positive mask rebuilt from labels (no [N,N] mask shipped from HBM).
    # Padded rows/cols use distinct negative ids, so they never match.
    pos_label = lab_q_ref[...] == lab_k_ref[...]             # [bq, bk] bool

    # Only diagonal-straddling tiles need the self-contrast mask; only the
    # (padded) last column block needs the column-validity mask.
    straddles_diag = jnp.logical_and(i * block_q < (j + 1) * block_k,
                                     j * block_k < (i + 1) * block_q)
    if n_valid < n_pad:
        needs_mask = jnp.logical_or(straddles_diag, j == last_j)
    else:
        needs_mask = straddles_diag

    @pl.when(needs_mask)
    def _masked_tile():
        row_ids = i * block_q + lax.broadcasted_iota(jnp.int32, (block_q, 1), 0)
        col_ids = j * block_k + lax.broadcasted_iota(jnp.int32, (1, block_k), 1)
        not_diag = row_ids != col_ids
        denom_ok = jnp.logical_and(not_diag, col_ids < n_valid)
        p = jnp.where(denom_ok, jnp.exp(s - m_b), 0.0)
        l_sc[...] += jnp.sum(p, axis=1, keepdims=True)
        pos_f = jnp.logical_and(pos_label, not_diag).astype(jnp.float32)
        ps_sc[...] += jnp.sum(pos_f * s, axis=1, keepdims=True)

    @pl.when(jnp.logical_not(needs_mask))
    def _plain_tile():
        p = jnp.exp(s - m_b)
        l_sc[...] += jnp.sum(p, axis=1, keepdims=True)
        pos_f = pos_label.astype(jnp.float32)
        ps_sc[...] += jnp.sum(pos_f * s, axis=1, keepdims=True)

    @pl.when(j == last_j)
    def _finalize():
        pc = pc_ref[...]
        if assume_normalized:
            lse = const_m + jnp.log(l_sc[...])
        else:
            lse = m_sc[...] + jnp.log(l_sc[...])
        safe_pc = jnp.where(pc > 0, pc, 1.0)
        mean_log_prob_pos = ps_sc[...] / safe_pc - lse
        # Rows with zero positives (padding rows; degenerate n_views=1 /
        # singleton labels, which give NaN in the PyTorch reference) emit 0.
        out_ref[...] = jnp.where(pc > 0, neg_scale * mean_log_prob_pos, 0.0)


def supcon_loss(
    features,
    features_2=None,   # TODO(synk): accepted for signature parity but unused, matching the reference forward.
    labels=None,
    mask=None,
    *,
    temperature=0.07,
    contrast_mode="all",
    base_temperature=0.07,
    assume_normalized=False,
):
    """JAX/Pallas port of SupConLoss.forward (contrast_mode='all'/'cross-modal').

    features: [bsz, n_views, ...].  Pass bf16 features for full-rate MXU
    (accumulation is always f32).  Set assume_normalized=True only for
    L2-normalized features (standard SupCon input); it replaces the online
    running max with a constant stabilizer 1/temperature.
    """
    features = jnp.asarray(features)
    if features.ndim < 3:
        raise ValueError("`features` needs to be [bsz, n_views, ...]")
    if features.ndim > 3:
        features = features.reshape(features.shape[0], features.shape[1], -1)
    if contrast_mode == "one":
        # TODO(synk): contrast_mode='one' anchor selection not wired up.
        raise NotImplementedError("contrast_mode='one' is not implemented")
    if contrast_mode not in ("all", "cross-modal"):
        raise ValueError(f"Unknown mode: {contrast_mode}")

    bsz, n_views, dim = features.shape

    if labels is not None and mask is not None:
        raise ValueError("Cannot define both `labels` and `mask`")
    if mask is not None:
        # TODO(synk): arbitrary (possibly asymmetric) user [bsz,bsz] masks are not
        # supported by the label-index-based kernel; only eye/label-equality masks.
        raise NotImplementedError("explicit `mask` is not supported by the Pallas kernel")

    if labels is None:
        group = jnp.arange(bsz, dtype=jnp.int32)              # eye mask == index equality
        counts = jnp.ones((bsz,), jnp.float32)
    else:
        lab = jnp.asarray(labels).reshape(-1)
        if lab.shape[0] != bsz:
            raise ValueError("Num of labels does not match num of features")
        same = lab[:, None] == lab[None, :]                    # [bsz, bsz] bool (tiny)
        group = jnp.argmax(same, axis=1).astype(jnp.int32)     # canonical non-negative id
        counts = jnp.sum(same, axis=1).astype(jnp.float32)

    # Positive count per anchor is feature independent: n_views * |class| - 1.
    pos_count_per_sample = n_views * counts - 1.0

    # contrast_feature = cat(unbind(features, 1), 0) -> view-major [N, dim]
    contrast = jnp.swapaxes(features, 0, 1).reshape(n_views * bsz, dim)
    row_group = jnp.tile(group, (n_views,))
    row_pc = jnp.tile(pos_count_per_sample, (n_views,))

    n = n_views * bsz
    # Contraction dim: 128 for small D, else multiples of 256 (v6e/v7x MXU depth).
    d_pad = 128 if dim <= 128 else _round_up(dim, 256)
    elem_bytes = jnp.dtype(contrast.dtype).itemsize
    tq, tk, n_pad = _pick_tiles(n, d_pad, elem_bytes)

    inv_temp = 1.0 / temperature
    neg_scale = -(temperature / base_temperature)

    feat = jnp.pad(contrast, ((0, n_pad - n), (0, d_pad - dim)))
    # Fold 1/temperature into the anchor operand ONLY (the contrast operand is
    # the same features; scaling `feat` itself would square the factor).
    q_scaled = feat * jnp.asarray(inv_temp, feat.dtype)
    k_t = feat.T                                               # [d_pad, n_pad]
    lab_q = jnp.pad(row_group, (0, n_pad - n), constant_values=-1).reshape(n_pad, 1)
    lab_k = jnp.pad(row_group, (0, n_pad - n), constant_values=-2).reshape(1, n_pad)
    pc = jnp.pad(row_pc, (0, n_pad - n)).reshape(n_pad, 1).astype(jnp.float32)

    grid = (n_pad // tq, n_pad // tk)
    n_scratch = 2 if assume_normalized else 3                  # (m), l, ps
    kernel = functools.partial(
        _supcon_kernel,
        assume_normalized=assume_normalized,
        const_m=inv_temp,
        neg_scale=neg_scale,
        block_q=tq,
        block_k=tk,
        n_valid=n,
        n_pad=n_pad,
    )

    per_anchor = pl.pallas_call(
        kernel,
        out_shape=jax.ShapeDtypeStruct((n_pad, 1), jnp.float32),
        grid_spec=pltpu.PrefetchScalarGridSpec(
            num_scalar_prefetch=0,
            grid=grid,
            in_specs=[
                pl.BlockSpec((tq, d_pad), lambda i, j: (i, 0)),   # anchor rows (pre-scaled)
                pl.BlockSpec((d_pad, tk), lambda i, j: (0, j)),   # contrast cols (pre-transposed)
                pl.BlockSpec((tq, 1), lambda i, j: (i, 0)),       # anchor group ids
                pl.BlockSpec((1, tk), lambda i, j: (0, j)),       # contrast group ids
                pl.BlockSpec((tq, 1), lambda i, j: (i, 0)),       # positive counts
            ],
            out_specs=pl.BlockSpec((tq, 1), lambda i, j: (i, 0)),
            scratch_shapes=[pltpu.VMEM((tq, 1), jnp.float32)] * n_scratch,
        ),
        compiler_params=pltpu.CompilerParams(
            dimension_semantics=("parallel", "arbitrary"),
            # Above v5e's 16 MiB / v6e's 32 MiB scoped defaults, below v7x's
            # 64 MiB physical VMEM.
            vmem_limit_bytes=48 * 1024 * 1024,
        ),
    )(q_scaled, k_t, lab_q, lab_k, pc)

    # loss.view(anchor_count, batch_size).mean() == mean over all N anchors.
    return jnp.mean(per_anchor[:n, 0])


def _supcon_loss_ref(features, labels=None, temperature=0.07, base_temperature=0.07):
    """Pure-JAX reference mirroring the PyTorch forward (contrast_mode='all')."""
    bsz, n_views, dim = features.shape
    cf = jnp.swapaxes(features, 0, 1).reshape(n_views * bsz, dim).astype(jnp.float32)
    n = n_views * bsz
    if labels is None:
        base = jnp.eye(bsz, dtype=jnp.float32)
    else:
        lab = jnp.asarray(labels).reshape(-1, 1)
        base = (lab == lab.T).astype(jnp.float32)
    adc = (cf @ cf.T) / temperature
    logits = adc - jnp.max(adc, axis=1, keepdims=True)
    mask = jnp.tile(base, (n_views, n_views))
    logits_mask = 1.0 - jnp.eye(n, dtype=jnp.float32)
    mask = mask * logits_mask
    exp_logits = jnp.exp(logits) * logits_mask
    log_prob = logits - jnp.log(exp_logits.sum(1, keepdims=True))
    mean_log_prob_pos = (mask * log_prob).sum(1) / mask.sum(1)
    loss = -(temperature / base_temperature) * mean_log_prob_pos
    return loss.reshape(n_views, bsz).mean()


if __name__ == "__main__":
    key = jax.random.PRNGKey(0)
    k1, k2 = jax.random.split(key)

    # Small case: [bsz=4, n_views=2, dim=32], L2-normalized (typical SupCon input).
    bsz, n_views, dim = 4, 2, 32
    feats = jax.random.normal(k1, (bsz, n_views, dim), dtype=jnp.float32)
    feats = feats / jnp.linalg.norm(feats, axis=-1, keepdims=True)
    labels = jnp.array([0, 1, 0, 1], dtype=jnp.int32)

    checks = []
    # SimCLR (eye mask): online-max path and normalized constant-stabilizer path.
    checks.append((supcon_loss(feats), _supcon_loss_ref(feats)))
    checks.append((supcon_loss(feats, assume_normalized=True), _supcon_loss_ref(feats)))
    # Supervised (labels) case, both paths.
    checks.append((supcon_loss(feats, labels=labels), _supcon_loss_ref(feats, labels=labels)))
    checks.append((supcon_loss(feats, labels=labels, assume_normalized=True),
                   _supcon_loss_ref(feats, labels=labels)))

    # Multi-block case exercising off-diagonal fast-path tiles, a padded last
    # column block and the online accumulation across column blocks
    # (n = 576 -> n_pad = 1024, grid (4, 2)).
    bsz2, dim2 = 288, 48
    feats2 = jax.random.normal(k2, (bsz2, n_views, dim2), dtype=jnp.float32)
    feats2 = feats2 / jnp.linalg.norm(feats2, axis=-1, keepdims=True)
    labels2 = jnp.arange(bsz2, dtype=jnp.int32) % 7
    checks.append((supcon_loss(feats2, labels=labels2),
                   _supcon_loss_ref(feats2, labels=labels2)))
    checks.append((supcon_loss(feats2, labels=labels2, assume_normalized=True),
                   _supcon_loss_ref(feats2, labels=labels2)))

    for got, want in checks:
        got = jax.block_until_ready(got)
        assert jnp.allclose(got, want, atol=2e-4, rtol=2e-4), (got, want)

    print("KERNEL_OK")
</pallas_src>

<mosaic_0001>
module attributes {stable_mosaic.version = 11 : i64} {
  func.func @_supcon_kernel(%arg0: i32, %arg1: i32, %arg2: memref<64x128xf32, #tpu.memory_space<vmem>>, %arg3: memref<128x128xf32, #tpu.memory_space<vmem>>, %arg4: memref<64x1xi32, #tpu.memory_space<vmem>>, %arg5: memref<1x128xi32, #tpu.memory_space<vmem>>, %arg6: memref<64x1xf32, #tpu.memory_space<vmem>>, %arg7: memref<64x1xf32, #tpu.memory_space<vmem>>, %arg8: memref<64x1xf32, #tpu.memory_space<vmem>>, %arg9: memref<64x1xf32, #tpu.memory_space<vmem>>, %arg10: memref<64x1xf32, #tpu.memory_space<vmem>>) attributes {dimension_semantics = [#tpu.dimension_semantics<parallel>, #tpu.dimension_semantics<arbitrary>], iteration_bounds = array<i64: 2, 1>, scalar_prefetch = 0 : i64, scratch_operands = 3 : i64, tpu.core_type = #tpu.core_type<tc>, window_params = [{transform_indices = @transform_0, window_bounds = array<i64: 64, 128>}, {transform_indices = @transform_1, window_bounds = array<i64: 128, 128>}, {transform_indices = @transform_2, window_bounds = array<i64: 64, 1>}, {transform_indices = @transform_3, window_bounds = array<i64: 1, 128>}, {transform_indices = @transform_4, window_bounds = array<i64: 64, 1>}, {transform_indices = @transform_5, window_bounds = array<i64: 64, 1>}]} {
    %c0_i32 = arith.constant 0 : i32
    %0 = arith.cmpi eq, %arg1, %c0_i32 : i32
    %1 = arith.extui %0 : i1 to i32
    %c0_i32_0 = arith.constant 0 : i32
    %2 = arith.cmpi ne, %1, %c0_i32_0 : i32
    scf.if %2 {
      %cst_25 = arith.constant 0xFF800000 : f32
      %40 = vector.broadcast %cst_25 : f32 to vector<64x1xf32>
      %c0_26 = arith.constant 0 : index
      %c0_27 = arith.constant 0 : index
      %41 = vector.load %arg8[%c0_26, %c0_27] : memref<64x1xf32, #tpu.memory_space<vmem>>, vector<64x1xf32>
      tpu.vector_store %arg8[%c0_26, %c0_27], %40 {strides = array<i32>} : memref<64x1xf32, #tpu.memory_space<vmem>>, vector<64x1xf32>,
      %cst_28 = arith.constant 0.000000e+00 : f32
      %42 = vector.broadcast %cst_28 : f32 to vector<64x1xf32>
      %c0_29 = arith.constant 0 : index
      %c0_30 = arith.constant 0 : index
      %43 = vector.load %arg9[%c0_29, %c0_30] : memref<64x1xf32, #tpu.memory_space<vmem>>, vector<64x1xf32>
      tpu.vector_store %arg9[%c0_29, %c0_30], %42 {strides = array<i32>} : memref<64x1xf32, #tpu.memory_space<vmem>>, vector<64x1xf32>,
      %cst_31 = arith.constant 0.000000e+00 : f32
      %44 = vector.broadcast %cst_31 : f32 to vector<64x1xf32>
      %c0_32 = arith.constant 0 : index
      %c0_33 = arith.constant 0 : index
      %45 = vector.load %arg10[%c0_32, %c0_33] : memref<64x1xf32, #tpu.memory_space<vmem>>, vector<64x1xf32>
      tpu.vector_store %arg10[%c0_32, %c0_33], %44 {strides = array<i32>} : memref<64x1xf32, #tpu.memory_space<vmem>>, vector<64x1xf32>,
    } else {
    }
    %c0 = arith.constant 0 : index
    %c0_1 = arith.constant 0 : index
    %3 = vector.load %arg2[%c0, %c0_1] : memref<64x128xf32, #tpu.memory_space<vmem>>, vector<64x128xf32>
    %c0_2 = arith.constant 0 : index
    %c0_3 = arith.constant 0 : index
    %4 = vector.load %arg3[%c0_2, %c0_3] : memref<128x128xf32, #tpu.memory_space<vmem>>, vector<128x128xf32>
    %cst = arith.constant dense<0.000000e+00> : vector<64x128xf32>
    %5 = tpu.matmul %3, %4, %cst {dimension_numbers = #tpu.dot_dimension_numbers<[1], [0], [0], [1], [0, 0, 1, 1], [], []>} : vector<64x128xf32>, vector<128x128xf32>, vector<64x128xf32> -> vector<64x128xf32>
    %c0_4 = arith.constant 0 : index
    %c0_5 = arith.constant 0 : index
    %6 = vector.load %arg8[%c0_4, %c0_5] : memref<64x1xf32, #tpu.memory_space<vmem>>, vector<64x1xf32>
    %cst_6 = arith.constant dense<0xFF800000> : vector<64xf32>
    %7 = vector.multi_reduction <maximumf>, %5, %cst_6 [1] : vector<64x128xf32> to vector<64xf32>
    %8 = vector.shape_cast %7 : vector<64xf32> to vector<64x1xf32>
    %9 = arith.maximumf %6, %8 : vector<64x1xf32>
    %10 = arith.subf %6, %9 : vector<64x1xf32>
    %11 = math.exp %10 : vector<64x1xf32>
    %c0_7 = arith.constant 0 : index
    %c0_8 = arith.constant 0 : index
    %12 = vector.load %arg9[%c0_7, %c0_8] : memref<64x1xf32, #tpu.memory_space<vmem>>, vector<64x1xf32>
    %13 = arith.mulf %11, %12 : vector<64x1xf32>
    %c0_9 = arith.constant 0 : index
    %c0_10 = arith.constant 0 : index
    %14 = vector.load %arg9[%c0_9, %c0_10] : memref<64x1xf32, #tpu.memory_space<vmem>>, vector<64x1xf32>
    tpu.vector_store %arg9[%c0_9, %c0_10], %13 {strides = array<i32>} : memref<64x1xf32, #tpu.memory_space<vmem>>, vector<64x1xf32>,
    %c0_11 = arith.constant 0 : index
    %c0_12 = arith.constant 0 : index
    %15 = vector.load %arg8[%c0_11, %c0_12] : memref<64x1xf32, #tpu.memory_space<vmem>>, vector<64x1xf32>
    tpu.vector_store %arg8[%c0_11, %c0_12], %9 {strides = array<i32>} : memref<64x1xf32, #tpu.memory_space<vmem>>, vector<64x1xf32>,
    %c0_13 = arith.constant 0 : index
    %c0_14 = arith.constant 0 : index
    %16 = vector.load %arg4[%c0_13, %c0_14] : memref<64x1xi32, #tpu.memory_space<vmem>>, vector<64x1xi32>
    %c0_15 = arith.constant 0 : index
    %c0_16 = arith.constant 0 : index
    %17 = vector.load %arg5[%c0_15, %c0_16] : memref<1x128xi32, #tpu.memory_space<vmem>>, vector<1x128xi32>
    %18 = vector.broadcast %16 : vector<64x1xi32> to vector<64x128xi32>
    %19 = vector.broadcast %17 : vector<1x128xi32> to vector<64x128xi32>
    %20 = arith.cmpi eq, %18, %19 : vector<64x128xi32>
    %c64_i32 = arith.constant 64 : i32
    %21 = arith.muli %arg0, %c64_i32 : i32
    %c1_i32 = arith.constant 1 : i32
    %22 = arith.addi %arg1, %c1_i32 : i32
    %c128_i32 = arith.constant 128 : i32
    %23 = arith.muli %22, %c128_i32 : i32
    %24 = arith.cmpi slt, %21, %23 : i32
    %c128_i32_17 = arith.constant 128 : i32
    %25 = arith.muli %arg1, %c128_i32_17 : i32
    %c1_i32_18 = arith.constant 1 : i32
    %26 = arith.addi %arg0, %c1_i32_18 : i32
    %c64_i32_19 = arith.constant 64 : i32
    %27 = arith.muli %26, %c64_i32_19 : i32
    %28 = arith.cmpi slt, %25, %27 : i32
    %29 = arith.andi %24, %28 : i1
    %c0_i32_20 = arith.constant 0 : i32
    %30 = arith.cmpi eq, %arg1, %c0_i32_20 : i32
    %31 = arith.ori %29, %30 : i1
    %32 = arith.extui %31 : i1 to i32
    %c0_i32_21 = arith.constant 0 : i32
    %33 = arith.cmpi ne, %32, %c0_i32_21 : i32
    scf.if %33 {
      %c64_i32_25 = arith.constant 64 : i32
      %40 = arith.muli %arg0, %c64_i32_25 : i32
      %41 = tpu.iota {dimensions = array<i32: 0>} : vector<64x1xi32>
      %42 = vector.broadcast %40 : i32 to vector<64x1xi32>
      %43 = arith.addi %42, %41 : vector<64x1xi32>
      %c128_i32_26 = arith.constant 128 : i32
      %44 = arith.muli %arg1, %c128_i32_26 : i32
      %45 = tpu.iota {dimensions = array<i32: 1>} : vector<1x128xi32>
      %46 = vector.broadcast %44 : i32 to vector<1x128xi32>
      %47 = arith.addi %46, %45 : vector<1x128xi32>
      %48 = vector.broadcast %43 : vector<64x1xi32> to vector<64x128xi32>
      %49 = vector.broadcast %47 : vector<1x128xi32> to vector<64x128xi32>
      %50 = arith.cmpi ne, %48, %49 : vector<64x128xi32>
      %c8_i32 = arith.constant 8 : i32
      %51 = vector.broadcast %c8_i32 : i32 to vector<1x128xi32>
      %52 = arith.cmpi slt, %47, %51 : vector<1x128xi32>
      %53 = vector.broadcast %52 : vector<1x128xi1> to vector<64x128xi1>
      %54 = arith.andi %50, %53 : vector<64x128xi1>
      %55 = vector.broadcast %9 : vector<64x1xf32> to vector<64x128xf32>
      %56 = arith.subf %5, %55 : vector<64x128xf32>
      %57 = math.exp %56 : vector<64x128xf32>
      %cst_27 = arith.constant 0.000000e+00 : f32
      %58 = vector.broadcast %cst_27 : f32 to vector<64x128xf32>
      %59 = arith.select %54, %57, %58 : vector<64x128xi1>, vector<64x128xf32>
      %c0_28 = arith.constant 0 : index
      %c0_29 = arith.constant 0 : index
      %60 = vector.load %arg9[%c0_28, %c0_29] : memref<64x1xf32, #tpu.memory_space<vmem>>, vector<64x1xf32>
      %cst_30 = arith.constant dense<0.000000e+00> : vector<64xf32>
      %61 = vector.multi_reduction <add>, %59, %cst_30 [1] : vector<64x128xf32> to vector<64xf32>
      %62 = vector.shape_cast %61 : vector<64xf32> to vector<64x1xf32>
      %63 = arith.addf %60, %62 : vector<64x1xf32>
      %c0_31 = arith.constant 0 : index
      %c0_32 = arith.constant 0 : index
      %64 = vector.load %arg9[%c0_31, %c0_32] : memref<64x1xf32, #tpu.memory_space<vmem>>, vector<64x1xf32>
      tpu.vector_store %arg9[%c0_31, %c0_32], %63 {strides = array<i32>} : memref<64x1xf32, #tpu.memory_space<vmem>>, vector<64x1xf32>,
      %65 = arith.andi %20, %50 : vector<64x128xi1>
      %66 = arith.extui %65 : vector<64x128xi1> to vector<64x128xi32>
      %67 = arith.sitofp %66 : vector<64x128xi32> to vector<64x128xf32>
      %c0_33 = arith.constant 0 : index
      %c0_34 = arith.constant 0 : index
      %68 = vector.load %arg10[%c0_33, %c0_34] : memref<64x1xf32, #tpu.memory_space<vmem>>, vector<64x1xf32>
      %69 = arith.mulf %67, %5 : vector<64x128xf32>
      %cst_35 = arith.constant dense<0.000000e+00> : vector<64xf32>
      %70 = vector.multi_reduction <add>, %69, %cst_35 [1] : vector<64x128xf32> to vector<64xf32>
      %71 = vector.shape_cast %70 : vector<64xf32> to vector<64x1xf32>
      %72 = arith.addf %68, %71 : vector<64x1xf32>
      %c0_36 = arith.constant 0 : index
      %c0_37 = arith.constant 0 : index
      %73 = vector.load %arg10[%c0_36, %c0_37] : memref<64x1xf32, #tpu.memory_space<vmem>>, vector<64x1xf32>
      tpu.vector_store %arg10[%c0_36, %c0_37], %72 {strides = array<i32>} : memref<64x1xf32, #tpu.memory_space<vmem>>, vector<64x1xf32>,
    } else {
    }
    %true = arith.constant true
    %34 = arith.xori %31, %true : i1
    %35 = arith.extui %34 : i1 to i32
    %c0_i32_22 = arith.constant 0 : i32
    %36 = arith.cmpi ne, %35, %c0_i32_22 : i32
    scf.if %36 {
      %40 = vector.broadcast %9 : vector<64x1xf32> to vector<64x128xf32>
      %41 = arith.subf %5, %40 : vector<64x128xf32>
      %42 = math.exp %41 : vector<64x128xf32>
      %c0_25 = arith.constant 0 : index
      %c0_26 = arith.constant 0 : index
      %43 = vector.load %arg9[%c0_25, %c0_26] : memref<64x1xf32, #tpu.memory_space<vmem>>, vector<64x1xf32>
      %cst_27 = arith.constant dense<0.000000e+00> : vector<64xf32>
      %44 = vector.multi_reduction <add>, %42, %cst_27 [1] : vector<64x128xf32> to vector<64xf32>
      %45 = vector.shape_cast %44 : vector<64xf32> to vector<64x1xf32>
      %46 = arith.addf %43, %45 : vector<64x1xf32>
      %c0_28 = arith.constant 0 : index
      %c0_29 = arith.constant 0 : index
      %47 = vector.load %arg9[%c0_28, %c0_29] : memref<64x1xf32, #tpu.memory_space<vmem>>, vector<64x1xf32>
      tpu.vector_store %arg9[%c0_28, %c0_29], %46 {strides = array<i32>} : memref<64x1xf32, #tpu.memory_space<vmem>>, vector<64x1xf32>,
      %48 = arith.extui %20 : vector<64x128xi1> to vector<64x128xi32>
      %49 = arith.sitofp %48 : vector<64x128xi32> to vector<64x128xf32>
      %c0_30 = arith.constant 0 : index
      %c0_31 = arith.constant 0 : index
      %50 = vector.load %arg10[%c0_30, %c0_31] : memref<64x1xf32, #tpu.memory_space<vmem>>, vector<64x1xf32>
      %51 = arith.mulf %49, %5 : vector<64x128xf32>
      %cst_32 = arith.constant dense<0.000000e+00> : vector<64xf32>
      %52 = vector.multi_reduction <add>, %51, %cst_32 [1] : vector<64x128xf32> to vector<64xf32>
      %53 = vector.shape_cast %52 : vector<64xf32> to vector<64x1xf32>
      %54 = arith.addf %50, %53 : vector<64x1xf32>
      %c0_33 = arith.constant 0 : index
      %c0_34 = arith.constant 0 : index
      %55 = vector.load %arg10[%c0_33, %c0_34] : memref<64x1xf32, #tpu.memory_space<vmem>>, vector<64x1xf32>
      tpu.vector_store %arg10[%c0_33, %c0_34], %54 {strides = array<i32>} : memref<64x1xf32, #tpu.memory_space<vmem>>, vector<64x1xf32>,
    } else {
    }
    %c0_i32_23 = arith.constant 0 : i32
    %37 = arith.cmpi eq, %arg1, %c0_i32_23 : i32
    %38 = arith.extui %37 : i1 to i32
    %c0_i32_24 = arith.constant 0 : i32
    %39 = arith.cmpi ne, %38, %c0_i32_24 : i32
    scf.if %39 {
      %c0_25 = arith.constant 0 : index
      %c0_26 = arith.constant 0 : index
      %40 = vector.load %arg6[%c0_25, %c0_26] : memref<64x1xf32, #tpu.memory_space<vmem>>, vector<64x1xf32>
      %c0_27 = arith.constant 0 : index
      %c0_28 = arith.constant 0 : index
      %41 = vector.load %arg8[%c0_27, %c0_28] : memref<64x1xf32, #tpu.memory_space<vmem>>, vector<64x1xf32>
      %c0_29 = arith.constant 0 : index
      %c0_30 = arith.constant 0 : index
      %42 = vector.load %arg9[%c0_29, %c0_30] : memref<64x1xf32, #tpu.memory_space<vmem>>, vector<64x1xf32>
      %43 = math.log %42 : vector<64x1xf32>
      %44 = arith.addf %41, %43 : vector<64x1xf32>
      %cst_31 = arith.constant 0.000000e+00 : f32
      %45 = vector.broadcast %cst_31 : f32 to vector<64x1xf32>
      %46 = arith.cmpf ogt, %40, %45 : vector<64x1xf32>
      %cst_32 = arith.constant 1.000000e+00 : f32
      %47 = vector.broadcast %cst_32 : f32 to vector<64x1xf32>
      %48 = arith.select %46, %40, %47 : vector<64x1xi1>, vector<64x1xf32>
      %c0_33 = arith.constant 0 : index
      %c0_34 = arith.constant 0 : index
      %49 = vector.load %arg10[%c0_33, %c0_34] : memref<64x1xf32, #tpu.memory_space<vmem>>, vector<64x1xf32>
      %50 = arith.divf %49, %48 : vector<64x1xf32>
      %51 = arith.subf %50, %44 : vector<64x1xf32>
      %cst_35 = arith.constant 0.000000e+00 : f32
      %52 = vector.broadcast %cst_35 : f32 to vector<64x1xf32>
      %53 = arith.cmpf ogt, %40, %52 : vector<64x1xf32>
      %cst_36 = arith.constant -1.000000e+00 : f32
      %54 = vector.broadcast %cst_36 : f32 to vector<64x1xf32>
      %55 = arith.mulf %54, %51 : vector<64x1xf32>
      %cst_37 = arith.constant 0.000000e+00 : f32
      %56 = vector.broadcast %cst_37 : f32 to vector<64x1xf32>
      %57 = arith.select %53, %55, %56 : vector<64x1xi1>, vector<64x1xf32>
      %c0_38 = arith.constant 0 : index
      %c0_39 = arith.constant 0 : index
      %58 = vector.load %arg7[%c0_38, %c0_39] : memref<64x1xf32, #tpu.memory_space<vmem>>, vector<64x1xf32>
      tpu.vector_store %arg7[%c0_38, %c0_39], %57 {strides = array<i32>} : memref<64x1xf32, #tpu.memory_space<vmem>>, vector<64x1xf32>,
    } else {
    }
    return
  }
  func.func @transform_0(%arg0: i32, %arg1: i32) -> (i32, i32) {
    %c0_i32 = arith.constant 0 : i32
    %c0_i32_0 = arith.constant 0 : i32
    return %arg0, %c0_i32 : i32, i32
  }
  func.func @transform_1(%arg0: i32, %arg1: i32) -> (i32, i32) {
    %c0_i32 = arith.constant 0 : i32
    %c0_i32_0 = arith.constant 0 : i32
    return %c0_i32, %arg1 : i32, i32
  }
  func.func @transform_2(%arg0: i32, %arg1: i32) -> (i32, i32) {
    %c0_i32 = arith.constant 0 : i32
    %c0_i32_0 = arith.constant 0 : i32
    return %arg0, %c0_i32 : i32, i32
  }
  func.func @transform_3(%arg0: i32, %arg1: i32) -> (i32, i32) {
    %c0_i32 = arith.constant 0 : i32
    %c0_i32_0 = arith.constant 0 : i32
    return %c0_i32, %arg1 : i32, i32
  }
  func.func @transform_4(%arg0: i32, %arg1: i32) -> (i32, i32) {
    %c0_i32 = arith.constant 0 : i32
    %c0_i32_0 = arith.constant 0 : i32
    return %arg0, %c0_i32 : i32, i32
  }
  func.func @transform_5(%arg0: i32, %arg1: i32) -> (i32, i32) {
    %c0_i32 = arith.constant 0 : i32
    %c0_i32_0 = arith.constant 0 : i32
    return %arg0, %c0_i32 : i32, i32
  }
}

</mosaic_0001>

<bundles_post_ra>
// kernel: tpu_custom_call.1
= control target key start
LH: loop header
LB: loop body
LE: loop exit
PB: predicated region body
PF: predicated region fallthrough
CT: control target
= control target key end

     0   :  { %s1545_s18 = smov 0   ;;  %s1547_s19 = smov 0   ;;  %s1973_s0 = inlined_call_operand.vmem [shape: f32[128,128], index: 0, kind: input, shape index: {}]   ;;  %s1974_s1 = inlined_call_operand.vmem [shape: f32[128,128], index: 1, kind: input, shape index: {}]   ;;  %s1975_s2 = inlined_call_operand.vmem [shape: s32[128,1], index: 2, kind: input, shape index: {}]   ;;  %s1976_s3 = inlined_call_operand.vmem [shape: s32[1,128], index: 3, kind: input, shape index: {}]   ;;  %s1977_s4 = inlined_call_operand.vmem [shape: f32[128,1], index: 4, kind: input, shape index: {}]   ;;  %s1978_s5 = inlined_call_operand.vmem [shape: f32[128,1], index: 5, kind: output, shape index: {}]  }
   0x1   :  { %s1549_s20 = smov 0  }
   0x2 LB: > { %s27_s21 = sadd.s32 1, %s1506_s19  ;;  %p1262_p0 = scmp.ge.s32.totalorder %s1510_s20, 1  ;;  %s1510_s20 = sphi %s1549_s20, %s15_s20   ;;  %s1506_s19 = sphi %s1547_s19, %s2010_s19   ;;  %s1502_s18 = sphi %s1545_s18, %s2009_s18  }
   0x3   : > { %p29_p1 = scmp.ge.s32.totalorder %s27_s21, 2  ;;  %p239_p2 = scmp.lt.s32.totalorder %s1510_s20, 3 }
   0x5   : > { %s2012_s21 = smov (%p29_p1, %s27_s21), 0  ;;  %p240_p3 = pnand %p1262_p0, %p239_p2 }
   0x6   : > { %s1263_s11 = sshll.u32 (!%p240_p3), %s1502_s18, 3  ;;  %s1272_s16 = sshll.u32 (!%p240_p3), %s1502_s18, 6 }
   0x7   : > { %243 = sbr.rel (%p240_p3) target bundleno = 718 (0x2ce), region = 40  ;;  %p285_p4 = scmp.lt.s32.totalorder (!%p240_p3), %s1263_s11, 15 }
   0xc   : > { %v367_v0 = vld [vmem:[%s1974_s1 + $0x78] sm:$0xff]  ;;  %v366_v1 = vld [vmem:[%s1974_s1 + $0x70] sm:$0xff]  ;;  %v365_v2 = vld [vmem:[%s1974_s1 + $0x68] sm:$0xff]  ;;  %s2014_s11 = smov (!%p285_p4, %s1263_s11), 15  ;;  %vm1979_vm0 = vcmask 7168   ;;  %v1512_v24 = vmov -inf  }
   0xd   : > { %1319 = vmatprep.subr.mxu0 %v367_v0  ;;  %1363 = vmatprep.subr.mxu1 %v367_v0  ;;  %v364_v3 = vld [vmem:[%s1974_s1 + $0x60] sm:$0xff]  ;;  %v363_v4 = vld [vmem:[%s1974_s1 + $0x58] sm:$0xff]  ;;  %v362_v5 = vld [vmem:[%s1974_s1 + $0x50] sm:$0xff]  ;;  %s1605_s28 = sshll.u32 %s2014_s11, 3  ;;  %321 = vst.msk [vmem:[#allocation2 + $0x8] sm:$0xff] %vm1979_vm0, %v1512_v24  ;;  %v1513_v33 = vmov 0  }
   0xe   : > { %1320 = vmatpush3.msra.mxu0 %v367_v0  ;;  %1379 = vmatpush3.msra.mxu1 %v367_v0  ;;  %v361_v6 = vld [vmem:[%s1974_s1 + $0x48] sm:$0xff]  ;;  %v360_v7 = vld [vmem:[%s1974_s1 + $0x40] sm:$0xff]  ;;  %v359_v8 = vld [vmem:[%s1974_s1 + $0x38] sm:$0xff]  ;;  %s288_s8 = scalar_lea.vmem %s1973_s0, %s1605_s28  ;;  %320 = vst.msk [vmem:[#allocation2] sm:$0xff] %vm1979_vm0, %v1512_v24  ;;  %v1514_v34 = vmov 0.0   ;;  %s1690_s15 = scalar_lea.vmem %s1975_s2, %s1605_s28 }
   0xf   : > { %1321 = vmatprep.subr.mxu0 %v366_v1  ;;  %1364 = vmatprep.subr.mxu1 %v366_v1  ;;  %v358_v9 = vld [vmem:[%s1974_s1 + $0x30] sm:$0xff]  ;;  %v357_v10 = vld [vmem:[%s1974_s1 + $0x28] sm:$0xff]  ;;  %v356_v11 = vld [vmem:[%s1974_s1 + $0x20] sm:$0xff]  ;;  %322 = vst.msk [vmem:[#allocation2 + $0x10] sm:$0xff] %vm1979_vm0, %v1512_v24  ;;  %s1853_s24 = scalar_lea.vmem %s1977_s4, %s1605_s28  ;;  %s1929_s27 = scalar_lea.vmem %s1978_s5, %s1605_s28 }
  0x10   : > { %1322 = vmatpush3.msra.mxu0 %v366_v1  ;;  %1380 = vmatpush3.msra.mxu1 %v366_v1  ;;  %v355_v12 = vld [vmem:[%s1974_s1 + $0x18] sm:$0xff]  ;;  %v354_v13 = vld [vmem:[%s1974_s1 + $0x10] sm:$0xff]  ;;  %v353_v14 = vld [vmem:[%s1974_s1 + $0x8] sm:$0xff]  ;;  %323 = vst.msk [vmem:[#allocation2 + $0x18] sm:$0xff] %vm1979_vm0, %v1512_v24 }
  0x11   : > { %1323 = vmatprep.subr.mxu0 %v365_v2  ;;  %1365 = vmatprep.subr.mxu1 %v365_v2  ;;  %v352_v15 = vld [vmem:[%s1974_s1] sm:$0xff]  ;;  %v345_v17 = vld [vmem:[%s288_s8 + $0x8] sm:$0xff]  ;;  %v346_v19 = vld [vmem:[%s288_s8 + $0x10] sm:$0xff]  ;;  %324 = vst.msk [vmem:[#allocation2 + $0x20] sm:$0xff] %vm1979_vm0, %v1512_v24 }
  0x12   : > { %1324 = vmatpush3.msra.mxu0 %v365_v2  ;;  %1381 = vmatpush3.msra.mxu1 %v365_v2  ;;  %v344_v16 = vld [vmem:[%s288_s8] sm:$0xff]  ;;  %v349_v20 = vld [vmem:[%s288_s8 + $0x28] sm:$0xff]  ;;  %v350_v21 = vld [vmem:[%s288_s8 + $0x30] sm:$0xff]  ;;  %325 = vst.msk [vmem:[#allocation2 + $0x28] sm:$0xff] %vm1979_vm0, %v1512_v24 }
  0x13   : > { %1325 = vmatprep.subr.mxu0 %v364_v3  ;;  %1366 = vmatprep.subr.mxu1 %v364_v3  ;;  %v348_v18 = vld [vmem:[%s288_s8 + $0x20] sm:$0xff]  ;;  %v347_v22 = vld [vmem:[%s288_s8 + $0x18] sm:$0xff]  ;;  %326 = vst.msk [vmem:[#allocation2 + $0x30] sm:$0xff] %vm1979_vm0, %v1512_v24  ;;  %327 = vst.msk [vmem:[#allocation2 + $0x38] sm:$0xff] %vm1979_vm0, %v1512_v24 }
  0x14   : > { %1326 = vmatpush3.msra.mxu0 %v364_v3  ;;  %1382 = vmatpush3.msra.mxu1 %v364_v3  ;;  %v351_v23 = vld [vmem:[%s288_s8 + $0x38] sm:$0xff]  ;;  %328 = vst.msk [vmem:[#allocation3] sm:$0xff] %vm1979_vm0, %v1514_v34  ;;  %329 = vst.msk [vmem:[#allocation3 + $0x8] sm:$0xff] %vm1979_vm0, %v1514_v34  ;;  %v474_v35 = vld [vmem:[#allocation2 + $0x8] sm:$0xff] }
  0x15   : > { %1327 = vmatprep.subr.mxu0 %v363_v4  ;;  %1367 = vmatprep.subr.mxu1 %v363_v4  ;;  %330 = vst.msk [vmem:[#allocation3 + $0x10] sm:$0xff] %vm1979_vm0, %v1514_v34  ;;  %331 = vst.msk [vmem:[#allocation3 + $0x18] sm:$0xff] %vm1979_vm0, %v1514_v34  ;;  %v473_v40 = vld [vmem:[#allocation2] sm:$0xff]  ;;  %v563_v54 = vld [vmem:[%s1690_s15 + $0x8] sm:$0xff] }
  0x16   : > { %1328 = vmatpush3.msra.mxu0 %v363_v4  ;;  %1383 = vmatpush3.msra.mxu1 %v363_v4  ;;  %332 = vst.msk [vmem:[#allocation3 + $0x20] sm:$0xff] %vm1979_vm0, %v1514_v34  ;;  %333 = vst.msk [vmem:[#allocation3 + $0x28] sm:$0xff] %vm1979_vm0, %v1514_v34  ;;  %v475_v55 = vld [vmem:[#allocation2 + $0x10] sm:$0xff]  ;;  %v565_v0 = vld [vmem:[%s1690_s15 + $0x18] sm:$0xff] }
  0x17   : > { %1329 = vmatprep.subr.mxu0 %v362_v5  ;;  %1368 = vmatprep.subr.mxu1 %v362_v5  ;;  %334 = vst.msk [vmem:[#allocation3 + $0x30] sm:$0xff] %vm1979_vm0, %v1514_v34  ;;  %335 = vst.msk [vmem:[#allocation3 + $0x38] sm:$0xff] %vm1979_vm0, %v1514_v34  ;;  %v476_v44 = vld [vmem:[#allocation2 + $0x18] sm:$0xff] }
  0x18   : > { %1330 = vmatpush3.msra.mxu0 %v362_v5  ;;  %1384 = vmatpush3.msra.mxu1 %v362_v5  ;;  %336 = vst.msk [vmem:[#allocation4] sm:$0xff] %vm1979_vm0, %v1514_v34  ;;  %337 = vst.msk [vmem:[#allocation4 + $0x8] sm:$0xff] %vm1979_vm0, %v1514_v34  ;;  %v477_v48 = vld [vmem:[#allocation2 + $0x20] sm:$0xff] }
  0x19   : > { %1331 = vmatprep.subr.mxu0 %v361_v6  ;;  %1369 = vmatprep.subr.mxu1 %v361_v6  ;;  %338 = vst.msk [vmem:[#allocation4 + $0x10] sm:$0xff] %vm1979_vm0, %v1514_v34  ;;  %339 = vst.msk [vmem:[#allocation4 + $0x18] sm:$0xff] %vm1979_vm0, %v1514_v34  ;;  %v478_v37 = vld [vmem:[#allocation2 + $0x28] sm:$0xff] }
  0x1a   : > { %1332 = vmatpush3.msra.mxu0 %v361_v6  ;;  %1385 = vmatpush3.msra.mxu1 %v361_v6  ;;  %340 = vst.msk [vmem:[#allocation4 + $0x20] sm:$0xff] %vm1979_vm0, %v1514_v34  ;;  %341 = vst.msk [vmem:[#allocation4 + $0x28] sm:$0xff] %vm1979_vm0, %v1514_v34  ;;  %v479_v60 = vld [vmem:[#allocation2 + $0x30] sm:$0xff]  ;;  %v480_v2 = vld [vmem:[#allocation2 + $0x38] sm:$0xff] }
  0x1b   : > { %1333 = vmatprep.subr.mxu0 %v360_v7  ;;  %1370 = vmatprep.subr.mxu1 %v360_v7  ;;  %342 = vst.msk [vmem:[#allocation4 + $0x30] sm:$0xff] %vm1979_vm0, %v1514_v34  ;;  %343 = vst.msk [vmem:[#allocation4 + $0x38] sm:$0xff] %vm1979_vm0, %v1514_v34 }
  0x1c   : > { %1334 = vmatpush3.msra.mxu0 %v360_v7  ;;  %1386 = vmatpush3.msra.mxu1 %v360_v7 }
  0x1d   : > { %1335 = vmatprep.subr.mxu0 %v359_v8  ;;  %1371 = vmatprep.subr.mxu1 %v359_v8 }
  0x1e   : > { %1336 = vmatpush3.msra.mxu0 %v359_v8  ;;  %1387 = vmatpush3.msra.mxu1 %v359_v8 }
  0x1f   : > { %1337 = vmatprep.subr.mxu0 %v358_v9  ;;  %1372 = vmatprep.subr.mxu1 %v358_v9 }
  0x20   : > { %1338 = vmatpush3.msra.mxu0 %v358_v9  ;;  %1388 = vmatpush3.msra.mxu1 %v358_v9 }
  0x21   : > { %1339 = vmatprep.subr.mxu0 %v357_v10  ;;  %1373 = vmatprep.subr.mxu1 %v357_v10 }
  0x22   : > { %1340 = vmatpush3.msra.mxu0 %v357_v10  ;;  %1389 = vmatpush3.msra.mxu1 %v357_v10  ;;  %v567_v10 = vld [vmem:[%s1690_s15 + $0x28] sm:$0xff] }
  0x23   : > { %1341 = vmatprep.subr.mxu0 %v356_v11  ;;  %1374 = vmatprep.subr.mxu1 %v356_v11 }
  0x24   : > { %1342 = vmatpush3.msra.mxu0 %v356_v11  ;;  %1390 = vmatpush3.msra.mxu1 %v356_v11 }
  0x25   : > { %1343 = vmatprep.subr.mxu0 %v355_v12  ;;  %1375 = vmatprep.subr.mxu1 %v355_v12 }
  0x26   : > { %1344 = vmatpush3.msra.mxu0 %v355_v12  ;;  %1391 = vmatpush3.msra.mxu1 %v355_v12 }
  0x27   : > { %1345 = vmatprep.subr.mxu0 %v354_v13  ;;  %1376 = vmatprep.subr.mxu1 %v354_v13 }
  0x28   : > { %1346 = vmatpush3.msra.mxu0 %v354_v13  ;;  %1392 = vmatpush3.msra.mxu1 %v354_v13  ;;  %v530_v13 = vld [vmem:[#allocation3 + $0x8] sm:$0xff] }
  0x29   : > { %1347 = vmatprep.subr.mxu0 %v353_v14  ;;  %1377 = vmatprep.subr.mxu1 %v353_v14 }
  0x2a   : > { %1348 = vmatpush3.msra.mxu0 %v353_v14  ;;  %1393 = vmatpush3.msra.mxu1 %v353_v14 }
  0x2b   : > { %1349 = vmatprep.subr.mxu0 %v352_v15  ;;  %1351 = vmatprep.mubr.f32.mxu0 %v344_v16  ;;  %v569_v16 = vld [vmem:[%s1690_s15 + $0x38] sm:$0xff] }
  0x2c   : > { %1350 = vmatpush3.msra.mxu0 %v352_v15  ;;  %1378 = vmatprep.subr.mxu1 %v352_v15 }
  0x2d   : > { %1352 = vmatmul.mubr.f32.vlgmr.msra.gmra.mxu0 %v345_v17  ;;  %1394 = vmatpush3.msra.mxu1 %v352_v15  ;;  %v534_v17 = vld [vmem:[#allocation3 + $0x28] sm:$0xff] }
  0x2e   : > { %1357 = vmatprep.mubr.f32.mxu1 %v348_v18  ;;  %1354 = vmatprep.mubr.f32.mxu0 %v346_v19 }
  0x2f   : > { %1358 = vmatmul.mubr.f32.vlgmr.msra.gmra.mxu1 %v349_v20  ;;  %1423 = vset.pattern.permute.xlu1 %v1513_v33  ;;  %v529_v20 = vld [vmem:[#allocation3] sm:$0xff] }
  0x30   : > { %1360 = vmatprep.mubr.f32.mxu1 %v350_v21  ;;  %1422 = vset.pattern.permute.xlu0 %v1513_v33 }
  0x31   : > { %1355 = vmatmul.mubr.f32.gmra.mxu0 %v347_v22 }
  0x33   : > { %1361 = vmatmul.mubr.f32.gmra.mxu1 %v351_v23  ;;  %v532_v23 = vld [vmem:[#allocation3 + $0x18] sm:$0xff] }
  0xed   : > { %v1628_v25 = vpop.f32.mrf.mxu0 }
  0xee   : > { %483 = vmax.xlane.f32.xlu0 %v1628_v25 }
  0xef   : > { %v1631_v26 = vpop.f32.mrf.mxu0  ;;  %v1633_v27 = vpop.f32.mrf.mxu1 }
  0xf0   : > { %491 = vmax.xlane.f32.xlu1 %v1633_v27 }
  0xf1   : > { %v1636_v28 = vpop.f32.mrf.mxu1  ;;  %v1638_v29 = vpop.f32.mrf.mxu0 }
  0xf2   : > { %481 = vmax.xlane.f32.xlu0 %v1631_v26 }
  0xf3   : > { %v1641_v30 = vpop.f32.mrf.mxu1  ;;  %v1644_v31 = vpop.f32.mrf.mxu0 }
  0xf4   : > { %487 = vmax.xlane.f32.xlu1 %v1638_v29 }
  0xf5   : > { %v1647_v32 = vpop.f32.mrf.mxu1 }
  0xf6   : > { %489 = vmax.xlane.f32.xlu0 %v1636_v28 }
  0xf8   : > { %485 = vmax.xlane.f32.xlu1 %v1644_v31 }
  0xfa   : > { %493 = vmax.xlane.f32.xlu0 %v1647_v32 }
  0xfc   : > { %495 = vmax.xlane.f32.xlu1 %v1641_v30 }
 0x177   : > { %v484_v36 = vpop.xlane.xlu0 %483 }
 0x178   : > { %v498_v38 = vmax.f32 %v474_v35, %v484_v36 }
 0x179   : > { %v492_v39 = vpop.xlane.xlu1 %491 }
 0x17a   : > { %v506_v41 = vsub.f32 %v474_v35, %v498_v38  ;;  %555 = vst.msk [vmem:[#allocation2 + $0x8] sm:$0xff] %vm1979_vm0, %v498_v38  ;;  %669 = vperm.xlu1 %1423, %v498_v38   ;;  %v502_v42 = vmax.f32 %v478_v37, %v492_v39  ;;  %v533_v35 = vld [vmem:[#allocation3 + $0x20] sm:$0xff]  ;;  %v531_v39 = vld [vmem:[#allocation3 + $0x10] sm:$0xff] }
 0x17b   : > { %v482_v43 = vpop.xlane.xlu0 %481  ;;  %v562_v38 = vld [vmem:[%s1690_s15] sm:$0xff] }
 0x17c   : > { %v515_v45 = vmul.f32 1.442695, %v506_v41  ;;  %v510_v46 = vsub.f32 %v478_v37, %v502_v42  ;;  %559 = vst.msk [vmem:[#allocation2 + $0x28] sm:$0xff] %vm1979_vm0, %v502_v42  ;;  %v497_v47 = vmax.f32 %v473_v40, %v482_v43 }
 0x17d   : > { %v488_v49 = vpop.xlane.xlu1 %487 }
 0x17e   : > { %1424 = vpow2.f32 %v515_v45  ;;  %v523_v50 = vmul.f32 1.442695, %v510_v46  ;;  %v505_v51 = vsub.f32 %v473_v40, %v497_v47  ;;  %554 = vst.msk [vmem:[#allocation2] sm:$0xff] %vm1979_vm0, %v497_v47  ;;  %664 = vperm.xlu0 %1422, %v497_v47   ;;  %689 = vperm.xlu1 %1423, %v502_v42   ;;  %v500_v52 = vmax.f32 %v476_v44, %v488_v49  ;;  %v535_v42 = vld [vmem:[#allocation3 + $0x30] sm:$0xff]  ;;  %v536_v46 = vld [vmem:[#allocation3 + $0x38] sm:$0xff] }
 0x17f   : > { %v490_v53 = vpop.xlane.xlu0 %489  ;;  %v564_v45 = vld [vmem:[%s1690_s15 + $0x10] sm:$0xff] }
 0x180   : > { %1426 = vpow2.f32 %v523_v50  ;;  %v513_v56 = vmul.f32 1.442695, %v505_v51  ;;  %v501_v57 = vmax.f32 %v477_v48, %v490_v53  ;;  %v508_v58 = vsub.f32 %v476_v44, %v500_v52  ;;  %557 = vst.msk [vmem:[#allocation2 + $0x18] sm:$0xff] %vm1979_vm0, %v500_v52  ;;  %v566_v50 = vld [vmem:[%s1690_s15 + $0x20] sm:$0xff]  ;;  %v568_v51 = vld [vmem:[%s1690_s15 + $0x30] sm:$0xff] }
 0x181   : > { %v486_v59 = vpop.xlane.xlu1 %485 }
 0x182   : > { %1428 = vpow2.f32 %v513_v56  ;;  %v509_v61 = vsub.f32 %v477_v48, %v501_v57  ;;  %558 = vst.msk [vmem:[#allocation2 + $0x20] sm:$0xff] %vm1979_vm0, %v501_v57  ;;  %v519_v62 = vmul.f32 1.442695, %v508_v58  ;;  %575 = vperm.xlu0 %1422, %v563_v54   ;;  %684 = vperm.xlu1 %1423, %v501_v57   ;;  %v499_v63 = vmax.f32 %v475_v55, %v486_v59 }
 0x183   : > { %v494_v1 = vpop.xlane.xlu0 %493 }
 0x184   : > { %v521_v3 = vmul.f32 1.442695, %v509_v61  ;;  %1430 = vpow2.f32 %v519_v62  ;;  %v507_v4 = vsub.f32 %v475_v55, %v499_v63  ;;  %556 = vst.msk [vmem:[#allocation2 + $0x10] sm:$0xff] %vm1979_vm0, %v499_v63  ;;  %v503_v5 = vmax.f32 %v479_v60, %v494_v1 }
 0x185   : > { %v496_v6 = vpop.xlane.xlu1 %495 }
 0x186   : > { %1432 = vpow2.f32 %v521_v3  ;;  %v517_v7 = vmul.f32 1.442695, %v507_v4  ;;  %581 = vperm.xlu0 %1422, %v565_v0   ;;  %679 = vperm.xlu1 %1423, %v500_v52   ;;  %v511_v8 = vsub.f32 %v479_v60, %v503_v5  ;;  %560 = vst.msk [vmem:[#allocation2 + $0x30] sm:$0xff] %vm1979_vm0, %v503_v5  ;;  %v504_v9 = vmax.f32 %v480_v2, %v496_v6 }
 0x187   : > { %v621_v52 = vlaneseq  ;;  %v1721_v0 = vstv %s1272_s16 }
 0x188   : > { %1434 = vpow2.f32 %v517_v7  ;;  %v525_v11 = vmul.f32 1.442695, %v511_v8  ;;  %v512_v12 = vsub.f32 %v480_v2, %v504_v9  ;;  %561 = vst.msk [vmem:[#allocation2 + $0x38] sm:$0xff] %vm1979_vm0, %v504_v9 }
 0x189   : > { %v1715_v56 = vshrl.u32 %v621_v52, 7  ;;  %v1727_v4 = vand.u32 127, %v621_v52 }
 0x18a   : > { %1436 = vpow2.f32 %v525_v11  ;;  %v527_v14 = vmul.f32 1.442695, %v512_v12  ;;  %587 = vperm.xlu0 %1422, %v567_v10   ;;  %674 = vperm.xlu1 %1423, %v499_v63  }
 0x18b   : > { %v1425_v15 = vpop.eup %1424  ;;  %v623_v62 = vadd.s32 8, %v1715_v56  ;;  %v627_v7 = vadd.s32 40, %v1715_v56  ;;  %vm651_vm1 = vcmp.lt.s32.totalorder %v1727_v4, 8 }
 0x18c   : > { %1438 = vpow2.f32 %v527_v14  ;;  %v538_v18 = vmul.f32 %v1425_v15, %v530_v13 }
 0x18d   : > { %v1427_v19 = vpop.eup %1426  ;;  %v1725_v3 = vadd.s32 %v1721_v0, %v623_v62  ;;  %v1736_v11 = vadd.s32 %v1721_v0, %v627_v7 }
 0x18e   : > { %593 = vperm.xlu0 %1422, %v569_v16   ;;  %694 = vperm.xlu1 %1423, %v503_v5   ;;  %547 = vst.msk [vmem:[#allocation3 + $0x8] sm:$0xff] %vm1979_vm0, %v538_v18  ;;  %v542_v21 = vmul.f32 %v1427_v19, %v534_v17  ;;  %v631_v16 = vadd.s32 %v1721_v0, %v1715_v56  ;;  %v625_v17 = vadd.s32 24, %v1715_v56 }
 0x18f   : > { %v1429_v22 = vpop.eup %1428  ;;  %vm644_vm2 = vcmp.ne.s32.totalorder %v1725_v3, %v1727_v4  ;;  %vm648_vm4 = vcmp.ne.s32.totalorder %v1736_v11, %v1727_v4 }
 0x190   : > { %551 = vst.msk [vmem:[#allocation3 + $0x28] sm:$0xff] %vm1979_vm0, %v542_v21  ;;  %v537_v24 = vmul.f32 %v1429_v22, %v529_v20  ;;  %vm655_vm3 = vmand %vm644_vm2, %vm651_vm1  ;;  %v624_v22 = vadd.s32 16, %v1715_v56  ;;  %vm643_vm7 = vcmp.ne.s32.totalorder %v631_v16, %v1727_v4 }
 0x191   : > { %v1431_v33 = vpop.eup %1430  ;;  %vm659_vm5 = vmand %vm648_vm4, %vm651_vm1 }
 0x192   : > { %699 = vperm.xlu1 %1423, %v504_v9   ;;  %546 = vst.msk [vmem:[#allocation3] sm:$0xff] %vm1979_vm0, %v537_v24  ;;  %v540_v36 = vmul.f32 %v1431_v33, %v532_v23  ;;  %v626_v9 = vadd.s32 32, %v1715_v56  ;;  %v634_v24 = vadd.s32 %v1721_v0, %v625_v17  ;;  %vm654_vm9 = vmand %vm643_vm7, %vm651_vm1 }
 0x193   : > { %v1433_v37 = vpop.eup %1432 }
 0x194   : > { %v541_v40 = vmul.f32 %v1433_v37, %v533_v35  ;;  %549 = vst.msk [vmem:[#allocation3 + $0x18] sm:$0xff] %vm1979_vm0, %v540_v36  ;;  %v1745_v14 = vadd.s32 %v1721_v0, %v626_v9  ;;  %v628_v37 = vadd.s32 48, %v1715_v56  ;;  %vm646_vm10 = vcmp.ne.s32.totalorder %v634_v24, %v1727_v4 }
 0x195   : > { %v1435_v41 = vpop.eup %1434  ;;  %vm657_vm11 = vmand %vm646_vm10, %vm651_vm1 }
 0x196   : > { %572 = vperm.xlu1 %1423, %v562_v38   ;;  %550 = vst.msk [vmem:[#allocation3 + $0x20] sm:$0xff] %vm1979_vm0, %v541_v40  ;;  %v539_v43 = vmul.f32 %v1435_v41, %v531_v39  ;;  %vm647_vm6 = vcmp.ne.s32.totalorder %v1745_v14, %v1727_v4  ;;  %v633_v40 = vadd.s32 %v1721_v0, %v624_v22 }
 0x197   : > { %v1437_v44 = vpop.eup %1436  ;;  %vm658_vm8 = vmand %vm647_vm6, %vm651_vm1 }
 0x198   : > { %548 = vst.msk [vmem:[#allocation3 + $0x10] sm:$0xff] %vm1979_vm0, %v539_v43  ;;  %v543_v47 = vmul.f32 %v1437_v44, %v535_v42  ;;  %vm645_vm12 = vcmp.ne.s32.totalorder %v633_v40, %v1727_v4 }
 0x199   : > { %v1439_v48 = vpop.eup %1438  ;;  %vm656_vm13 = vmand %vm645_vm12, %vm651_vm1 }
 0x19a   : > { %578 = vperm.xlu1 %1423, %v564_v45   ;;  %552 = vst.msk [vmem:[#allocation3 + $0x30] sm:$0xff] %vm1979_vm0, %v543_v47  ;;  %v544_v49 = vmul.f32 %v1439_v48, %v536_v46  ;;  %v637_v47 = vadd.s32 %v1721_v0, %v628_v37  ;;  %v629_v48 = vadd.s32 56, %v1715_v56 }
 0x19b   : > { %v737_v24 = vld [vmem:[#allocation3 + $0x18] sm:$0xff] }
 0x19c   : > { %553 = vst.msk [vmem:[#allocation3 + $0x38] sm:$0xff] %vm1979_vm0, %v544_v49  ;;  %vm1980_vm14 = vcmp.ne.s32.totalorder %v637_v47, %v1727_v4 }
 0x19e   : > { %584 = vperm.xlu1 %1423, %v566_v50  }
 0x19f   : > { %v736_v40 = vld [vmem:[#allocation3 + $0x10] sm:$0xff] }
 0x1a2   : > { %590 = vperm.xlu1 %1423, %v568_v51   ;;  %v1271_v51 = vld [vmem:[%s1976_s3] ss:$0 sm:$0xff] }
 0x1f5   : > { %v670_v53 = vpop.permute.xlu1 %669 }
 0x1f6   : > { %v703_v54 = vsub.f32 %v1628_v25, %v670_v53  ;;  %v638_v53 = vadd.s32 %v1721_v0, %v629_v48  ;;  %v740_v48 = vld [vmem:[#allocation3 + $0x30] sm:$0xff] }
 0x1f8   : > { %v712_v55 = vmul.f32 1.442695, %v703_v54 }
 0x1f9   : > { %v665_v57 = vpop.permute.xlu0 %664  ;;  %v690_v58 = vpop.permute.xlu1 %689 }
 0x1fa   : > { %1440 = vpow2.f32 %v712_v55  ;;  %v702_v59 = vsub.f32 %v1631_v26, %v665_v57  ;;  %v707_v60 = vsub.f32 %v1633_v27, %v690_v58 }
 0x1fc   : > { %v720_v61 = vmul.f32 1.442695, %v707_v60  ;;  %v710_v63 = vmul.f32 1.442695, %v702_v59  ;;  %v1904_v60 = vld [vmem:[%s1853_s24 + $0x38] sm:$0xff] }
 0x1fd   : > { %v685_v1 = vpop.permute.xlu1 %684  ;;  %v576_v44 = vpop.permute.xlu0 %575 }
 0x1fe   : > { %v706_v2 = vsub.f32 %v1636_v28, %v685_v1  ;;  %1442 = vpow2.f32 %v720_v61 }
 0x1ff   : > { %1444 = vpow2.f32 %v710_v63 }
 0x200   : > { %v718_v5 = vmul.f32 1.442695, %v706_v2 }
 0x201   : > { %v680_v6 = vpop.permute.xlu1 %679  ;;  %v582_v55 = vpop.permute.xlu0 %581 }
 0x202   : > { %1446 = vpow2.f32 %v718_v5  ;;  %v705_v8 = vsub.f32 %v1638_v29, %v680_v6 }
 0x204   : > { %v716_v10 = vmul.f32 1.442695, %v705_v8 }
 0x205   : > { %v675_v12 = vpop.permute.xlu1 %674  ;;  %v588_v63 = vpop.permute.xlu0 %587 }
 0x206   : > { %1448 = vpow2.f32 %v716_v10  ;;  %v704_v13 = vsub.f32 %v1644_v31, %v675_v12 }
 0x207   : > { %v1441_v15 = vpop.eup %1440 }
 0x208   : > { %v714_v18 = vmul.f32 1.442695, %v704_v13  ;;  %v727_v19 = vsel %vm655_vm3, %v1441_v15, 0.0  ;;  %vm1796_vm3 = vmand %vm1980_vm14, %vm651_vm1 }
 0x209   : > { %744 = vadd.xlane.f32.xlu0 %v727_v19  ;;  %v695_v20 = vpop.permute.xlu1 %694  ;;  %v594_v7 = vpop.permute.xlu0 %593 }
 0x20a   : > { %1450 = vpow2.f32 %v714_v18  ;;  %v708_v21 = vsub.f32 %v1647_v32, %v695_v20  ;;  %v734_v20 = vld [vmem:[#allocation3] sm:$0xff] }
 0x20b   : > { %v1443_v23 = vpop.eup %1442 }
 0x20c   : > { %v722_v33 = vmul.f32 1.442695, %v708_v21  ;;  %v731_v35 = vsel %vm659_vm5, %v1443_v23, 0.0  ;;  %v1445_v38 = vpop.eup %1444  ;;  %vm600_vm5 = vcmp.eq.s32.totalorder %v576_v44, %v1271_v51  ;;  %v1861_v23 = vld [vmem:[%s1853_s24 + $0x8] sm:$0xff] }
 0x20d   : > { %v700_v36 = vpop.permute.xlu1 %699  ;;  %752 = vadd.xlane.f32.xlu1 %v731_v35  ;;  %v726_v45 = vsel %vm654_vm9, %v1445_v38, 0.0  ;;  %vm650_vm9 = vcmp.ne.s32.totalorder %v638_v53, %v1727_v4  ;;  %vm775_vm0 = vmand %vm600_vm5, %vm644_vm2  ;;  %vm604_vm2 = vcmp.eq.s32.totalorder %v588_v63, %v1271_v51  ;;  %v1866_v35 = vld [vmem:[%s1853_s24 + $0x10] sm:$0xff]  ;;  %v1873_v38 = vld [vmem:[%s1853_s24 + $0x18] sm:$0xff] }
 0x20e   : > { %1452 = vpow2.f32 %v722_v33  ;;  %v709_v39 = vsub.f32 %v1641_v30, %v700_v36  ;;  %v1276_v5 = vsel %vm775_vm0, 1.0, %v1514_v34  ;;  %vm1985_vm0 = vcmp.ne.s32.totalorder %v637_v47, %v1727_v4  ;;  %v739_v4 = vld [vmem:[#allocation3 + $0x28] sm:$0xff]  ;;  %v798_v53 = vld [vmem:[#allocation4] sm:$0xff] }
 0x20f   : > { %v1447_v41 = vpop.eup %1446 }
 0x210   : > { %v724_v42 = vmul.f32 1.442695, %v709_v39  ;;  %v730_v43 = vsel %vm658_vm8, %v1447_v41, 0.0 }
 0x211   : > { %750 = vadd.xlane.f32.xlu0 %v730_v43  ;;  %v573_v46 = vpop.permute.xlu1 %572  ;;  %742 = vadd.xlane.f32.xlu1 %v726_v45 }
 0x212   : > { %1454 = vpow2.f32 %v724_v42  ;;  %vm599_vm15 = vcmp.eq.s32.totalorder %v573_v46, %v1271_v51  ;;  %v1877_v42 = vld [vmem:[%s1853_s24 + $0x20] sm:$0xff] }
 0x213   : > { %v1449_v49 = vpop.eup %1448  ;;  %vm774_vm8 = vmand %vm599_vm15, %vm643_vm7  ;;  %vm602_vm7 = vcmp.eq.s32.totalorder %v582_v55, %v1271_v51 }
 0x214   : > { %v729_v50 = vsel %vm657_vm11, %v1449_v49, 0.0  ;;  %v1275_v62 = vsel %vm774_vm8, 1.0, %v1514_v34 }
 0x215   : > { %v579_v52 = vpop.permute.xlu1 %578  ;;  %748 = vadd.xlane.f32.xlu1 %v729_v50  ;;  %v806_v2 = vmul.f32 %v1275_v62, %v1631_v26  ;;  %v807_v26 = vmul.f32 %v1628_v25, %v1276_v5  ;;  %v1890_v50 = vld [vmem:[%s1853_s24 + $0x30] sm:$0xff] }
 0x216   : > { %vm601_vm11 = vcmp.eq.s32.totalorder %v579_v52, %v1271_v51 }
 0x217   : > { %v1451_v54 = vpop.eup %1450  ;;  %vm776_vm15 = vmand %vm601_vm11, %vm645_vm12 }
 0x218   : > { %v728_v56 = vsel %vm656_vm13, %v1451_v54, 0.0  ;;  %vm1807_vm13 = vmand %vm650_vm9, %vm651_vm1  ;;  %v1277_v6 = vsel %vm776_vm15, 1.0, %v1514_v34  ;;  %v1896_v54 = vld [vmem:[%s1853_s24 + $0x28] sm:$0xff] }
 0x219   : > { %746 = vadd.xlane.f32.xlu0 %v728_v56  ;;  %v585_v58 = vpop.permute.xlu1 %584  ;;  %vm777_vm1 = vmand %vm602_vm7, %vm646_vm10  ;;  %v808_v8 = vmul.f32 %v1277_v6, %v1644_v31  ;;  %vm1069_vm7 = vcmp.gt.f32.partialorder %v1861_v23, 0.0 }
 0x21a   : > { %vm603_vm14 = vcmp.eq.s32.totalorder %v585_v58, %v1271_v51  ;;  %vm779_vm10 = vmand %vm604_vm2, %vm648_vm4  ;;  %v1278_v9 = vsel %vm777_vm1, 1.0, %v1514_v34  ;;  %vm1070_vm1 = vcmp.gt.f32.partialorder %v1866_v35, 0.0  ;;  %v1077_v44 = vsel %vm1069_vm7, %v1861_v23, 1.0  ;;  %v741_v58 = vld [vmem:[#allocation3 + $0x38] sm:$0xff] }
 0x21b   : > { %v1453_v59 = vpop.eup %1452  ;;  %vm778_vm12 = vmand %vm603_vm14, %vm647_vm6  ;;  %vm606_vm6 = vcmp.eq.s32.totalorder %v594_v7, %v1271_v51  ;;  %v809_v12 = vmul.f32 %v1638_v29, %v1278_v9  ;;  %v1280_v31 = vsel %vm779_vm10, 1.0, %v1514_v34  ;;  %v735_v29 = vld [vmem:[#allocation3 + $0x8] sm:$0xff]  ;;  %vm1986_vm14 = vcmask 7168  }
 0x21c   : > { %v732_v61 = vsel %vm1796_vm3, %v1453_v59, 0.0  ;;  %v1279_v10 = vsel %vm778_vm12, 1.0, %v1514_v34  ;;  %vm781_vm4 = vmand %vm606_vm6, %vm650_vm9  ;;  %v811_v11 = vmul.f32 %v1633_v27, %v1280_v31  ;;  %vm1071_vm2 = vcmp.gt.f32.partialorder %v1873_v38, 0.0 }
 0x21d   : > { %754 = vadd.xlane.f32.xlu0 %v732_v61  ;;  %v591_v1 = vpop.permute.xlu1 %590  ;;  %v810_v25 = vmul.f32 %v1279_v10, %v1636_v28  ;;  %v1282_v15 = vsel %vm781_vm4, 1.0, %v1514_v34  ;;  %vm1987_vm8 = vmmov %vm1986_vm14  ;;  %v1078_v47 = vsel %vm1070_vm1, %v1866_v35, 1.0  ;;  %v1079_v52 = vsel %vm1071_vm2, %v1873_v38, 1.0  ;;  %v802_v10 = vld [vmem:[#allocation4 + $0x20] sm:$0xff] }
 0x21e   : > { %vm605_vm3 = vcmp.eq.s32.totalorder %v591_v1, %v1271_v51  ;;  %v813_v28 = vmul.f32 %v1641_v30, %v1282_v15  ;;  %v738_v30 = vld [vmem:[#allocation3 + $0x20] sm:$0xff]  ;;  %vm1988_vm9 = vmmov %vm1987_vm8  ;;  %v800_v1 = vld [vmem:[#allocation4 + $0x10] sm:$0xff] }
 0x21f   : > { %v1455_v0 = vpop.eup %1454  ;;  %vm780_vm5 = vmand %vm605_vm3, %vm1985_vm0  ;;  %vm1072_vm3 = vcmp.gt.f32.partialorder %v1877_v42, 0.0  ;;  %vm1074_vm0 = vcmp.gt.f32.partialorder %v1890_v50, 0.0 }
 0x220   : > { %v733_v3 = vsel %vm1807_vm13, %v1455_v0, 0.0  ;;  %v1281_v13 = vsel %vm780_vm5, 1.0, %v1514_v34  ;;  %v1857_v34 = vld [vmem:[%s1853_s24] sm:$0xff]  ;;  %vm1989_vm13 = vmmov %vm1987_vm8  ;;  %v1080_v55 = vsel %vm1072_vm3, %v1877_v42, 1.0  ;;  %vm1073_vm5 = vcmp.gt.f32.partialorder %v1896_v54, 0.0 }
 0x221   : > { %756 = vadd.xlane.f32.xlu1 %v733_v3  ;;  %814 = vadd.xlane.f32.xlu0 %v806_v2  ;;  %v812_v14 = vmul.f32 %v1281_v13, %v1647_v32  ;;  %vm1068_vm11 = vcmp.gt.f32.partialorder %v1857_v34, 0.0  ;;  %vm1990_vm15 = vmmov %vm1987_vm8  ;;  %v799_v2 = vld [vmem:[#allocation4 + $0x8] sm:$0xff]  ;;  %v1082_v3 = vsel %vm1074_vm0, %v1890_v50, 1.0  ;;  %v1081_v7 = vsel %vm1073_vm5, %v1896_v54, 1.0 }
 0x222   : > { %v1076_v37 = vsel %vm1068_vm11, %v1857_v34, 1.0  ;;  %vm1991_vm12 = vmmov %vm1987_vm8 }
 0x223   : > { %1456 = vrcp.f32 %v1076_v37  ;;  %vm1992_vm10 = vmmov %vm1987_vm8 }
 0x224   : > { %vm1993_vm6 = vmmov %vm1987_vm8 }
 0x225   : > { %816 = vadd.xlane.f32.xlu1 %v807_v26  ;;  %818 = vadd.xlane.f32.xlu0 %v808_v8  ;;  %vm1994_vm4 = vmmov %vm1993_vm6 }
 0x229   : > { %820 = vadd.xlane.f32.xlu1 %v809_v12  ;;  %822 = vadd.xlane.f32.xlu0 %v810_v25  ;;  %v801_v12 = vld [vmem:[#allocation4 + $0x18] sm:$0xff] }
 0x22d   : > { %824 = vadd.xlane.f32.xlu1 %v811_v11  ;;  %826 = vadd.xlane.f32.xlu0 %v812_v14 }
 0x230   : > { %v1457_v25 = vpop.eup %1456 }
 0x231   : > { %828 = vadd.xlane.f32.xlu1 %v813_v28 }
 0x292   : > { %v745_v16 = vpop.xlane.xlu0 %744 }
 0x293   : > { %v759_v17 = vadd.f32 %v745_v16, %v735_v29  ;;  %v804_v16 = vld [vmem:[#allocation4 + $0x30] sm:$0xff] }
 0x295   : > { %767 = vst.msk [vmem:[#allocation3 + $0x8] sm:$0xff] %vm1986_vm14, %v759_v17  ;;  %vm1075_vm14 = vcmp.gt.f32.partialorder %v1904_v60, 0.0 }
 0x296   : > { %v753_v18 = vpop.xlane.xlu1 %752  ;;  %v1083_v31 = vsel %vm1075_vm14, %v1904_v60, 1.0 }
 0x297   : > { %v763_v27 = vadd.f32 %v753_v18, %v739_v4 }
 0x299   : > { %771 = vst.msk [vmem:[#allocation3 + $0x28] sm:$0xff] %vm1987_vm8, %v763_v27  ;;  %vm1995_vm8 = vmmov %vm1994_vm4 }
 0x29a   : > { %v751_v32 = vpop.xlane.xlu0 %750  ;;  %v743_v21 = vpop.xlane.xlu1 %742 }
 0x29b   : > { %v762_v19 = vadd.f32 %v751_v32, %v738_v30  ;;  %v758_v22 = vadd.f32 %v743_v21, %v734_v20  ;;  %v803_v30 = vld [vmem:[#allocation4 + $0x28] sm:$0xff] }
 0x29c   : > { %v1037_v39 = vld [vmem:[#allocation3 + $0x8] sm:$0xff] }
 0x29d   : > { %770 = vst.msk [vmem:[#allocation3 + $0x20] sm:$0xff] %vm1988_vm9, %v762_v19  ;;  %1458 = vlog2.f32 %v1037_v39  ;;  %vm1996_vm9 = vmmov %vm1994_vm4  ;;  %v1028_v19 = vld [vmem:[#allocation2] sm:$0xff] }
 0x29e   : > { %766 = vst.msk [vmem:[#allocation3] sm:$0xff] %vm1989_vm13, %v758_v22  ;;  %v749_v33 = vpop.xlane.xlu1 %748  ;;  %vm1997_vm13 = vmmov %vm1994_vm4 }
 0x29f   : > { %v761_v36 = vadd.f32 %v749_v33, %v737_v24 }
 0x2a0   : > { %v1041_v61 = vld [vmem:[#allocation3 + $0x28] sm:$0xff] }
 0x2a1   : > { %769 = vst.msk [vmem:[#allocation3 + $0x18] sm:$0xff] %vm1990_vm15, %v761_v36  ;;  %vm1998_vm15 = vmmov %vm1994_vm4 }
 0x2a2   : > { %v747_v41 = vpop.xlane.xlu0 %746 }
 0x2a3   : > { %v760_v43 = vadd.f32 %v747_v41, %v736_v40 }
 0x2a4   : > { %v1040_v45 = vld [vmem:[#allocation3 + $0x20] sm:$0xff] }
 0x2a5   : > { %v1036_v46 = vld [vmem:[#allocation3] sm:$0xff]  ;;  %768 = vst.msk [vmem:[#allocation3 + $0x10] sm:$0xff] %vm1991_vm12, %v760_v43  ;;  %v1029_v43 = vld [vmem:[#allocation2 + $0x8] sm:$0xff]  ;;  %vm1999_vm12 = vmmov %vm1994_vm4 }
 0x2a6   : > { %1460 = vlog2.f32 %v1036_v46  ;;  %v755_v49 = vpop.xlane.xlu0 %754 }
 0x2a7   : > { %1462 = vrcp.f32 %v1077_v44  ;;  %v764_v51 = vadd.f32 %v755_v49, %v740_v48 }
 0x2a8   : > { %1464 = vlog2.f32 %v1040_v45  ;;  %v1039_v56 = vld [vmem:[#allocation3 + $0x18] sm:$0xff] }
 0x2a9   : > { %1466 = vrcp.f32 %v1078_v47  ;;  %772 = vst.msk [vmem:[#allocation3 + $0x30] sm:$0xff] %vm1992_vm10, %v764_v51  ;;  %v805_v47 = vld [vmem:[#allocation4 + $0x38] sm:$0xff]  ;;  %vm2000_vm10 = vmmov %vm1994_vm4 }
 0x2aa   : > { %1468 = vlog2.f32 %v1039_v56  ;;  %v815_v57 = vpop.xlane.xlu0 %814  ;;  %v757_v59 = vpop.xlane.xlu1 %756 }
 0x2ab   : > { %1470 = vrcp.f32 %v1079_v52  ;;  %v830_v62 = vadd.f32 %v815_v57, %v798_v53  ;;  %v765_v63 = vadd.f32 %v757_v59, %v741_v58  ;;  %v1459_v13 = vpop.eup %1458  ;;  %v1032_v59 = vld [vmem:[#allocation2 + $0x20] sm:$0xff] }
 0x2ac   : > { %1472 = vrcp.f32 %v1080_v55  ;;  %v1038_v0 = vld [vmem:[#allocation3 + $0x10] sm:$0xff]  ;;  %v1047_v20 = vmul.f32 0.6931472, %v1459_v13 }
 0x2ad   : > { %1474 = vlog2.f32 %v1038_v0  ;;  %838 = vst.msk [vmem:[#allocation4] sm:$0xff] %vm1993_vm6, %v830_v62  ;;  %v1030_v0 = vld [vmem:[#allocation2 + $0x10] sm:$0xff]  ;;  %vm2001_vm6 = vmmov %vm1994_vm4 }
 0x2ae   : > { %773 = vst.msk [vmem:[#allocation3 + $0x38] sm:$0xff] %vm1994_vm4, %v765_v63  ;;  %1476 = vlog2.f32 %v1041_v61  ;;  %v819_v5 = vpop.xlane.xlu0 %818  ;;  %v817_v6 = vpop.xlane.xlu1 %816  ;;  %v1061_v51 = vadd.f32 %v1047_v20, %v1029_v43 }
 0x2af   : > { %v832_v26 = vadd.f32 %v819_v5, %v800_v1  ;;  %v831_v8 = vadd.f32 %v817_v6, %v799_v2  ;;  %1478 = vrcp.f32 %v1082_v3 }
 0x2b0   : > { %v1042_v9 = vld [vmem:[#allocation3 + $0x30] sm:$0xff] }
 0x2b1   : > { %1480 = vlog2.f32 %v1042_v9  ;;  %840 = vst.msk [vmem:[#allocation4 + $0x10] sm:$0xff] %vm1995_vm8, %v832_v26  ;;  %v1031_v26 = vld [vmem:[#allocation2 + $0x18] sm:$0xff]  ;;  %vm2004_vm8 = vmmov %vm1994_vm4 }
 0x2b2   : > { %839 = vst.msk [vmem:[#allocation4 + $0x8] sm:$0xff] %vm1996_vm9, %v831_v8  ;;  %1482 = vrcp.f32 %v1081_v7  ;;  %v823_v11 = vpop.xlane.xlu0 %822  ;;  %v821_v14 = vpop.xlane.xlu1 %820  ;;  %vm2005_vm9 = vmmov %vm1994_vm4 }
 0x2b3   : > { %v1461_v15 = vpop.eup %1460  ;;  %v834_v28 = vadd.f32 %v823_v11, %v802_v10  ;;  %v833_v29 = vadd.f32 %v821_v14, %v801_v12  ;;  %1484 = vrcp.f32 %v1083_v31 }
 0x2b4   : > { %v1463_v17 = vpop.eup %1462  ;;  %v1045_v4 = vmul.f32 0.6931472, %v1461_v15  ;;  %v1084_v18 = vld [vmem:[#allocation4] sm:$0xff] }
 0x2b5   : > { %v1043_v27 = vld [vmem:[#allocation3 + $0x38] sm:$0xff]  ;;  %v1465_v32 = vpop.eup %1464  ;;  %v1093_v21 = vmul.f32 %v1457_v25, %v1084_v18  ;;  %842 = vst.msk [vmem:[#allocation4 + $0x20] sm:$0xff] %vm1997_vm13, %v834_v28 }
 0x2b6   : > { %1486 = vlog2.f32 %v1043_v27  ;;  %841 = vst.msk [vmem:[#allocation4 + $0x18] sm:$0xff] %vm1998_vm15, %v833_v29  ;;  %v1467_v22 = vpop.eup %1466  ;;  %v1060_v24 = vadd.f32 %v1045_v4, %v1028_v19  ;;  %v827_v33 = vpop.xlane.xlu0 %826  ;;  %v1053_v44 = vmul.f32 0.6931472, %v1465_v32  ;;  %v1034_v29 = vld [vmem:[#allocation2 + $0x30] sm:$0xff]  ;;  %v1033_v27 = vld [vmem:[#allocation2 + $0x28] sm:$0xff] }
 0x2b7   : > { %v825_v36 = vpop.xlane.xlu1 %824  ;;  %v1469_v37 = vpop.eup %1468  ;;  %v836_v39 = vadd.f32 %v827_v33, %v804_v16 }
 0x2b8   : > { %v835_v40 = vadd.f32 %v825_v36, %v803_v30  ;;  %v1471_v41 = vpop.eup %1470  ;;  %v1108_v45 = vsub.f32 %v1093_v21, %v1060_v24  ;;  %v1086_v49 = vld [vmem:[#allocation4 + $0x10] sm:$0xff]  ;;  %v1051_v55 = vmul.f32 0.6931472, %v1469_v37  ;;  %v1064_v3 = vadd.f32 %v1053_v44, %v1032_v59 }
 0x2b9   : > { %v1085_v46 = vld [vmem:[#allocation4 + $0x8] sm:$0xff]  ;;  %v1473_v48 = vpop.eup %1472  ;;  %844 = vst.msk [vmem:[#allocation4 + $0x30] sm:$0xff] %vm1999_vm12, %v836_v39  ;;  %v1097_v2 = vmul.f32 %v1467_v22, %v1086_v49 }
 0x2ba   : > { %v1095_v52 = vmul.f32 %v1463_v17, %v1085_v46  ;;  %843 = vst.msk [vmem:[#allocation4 + $0x28] sm:$0xff] %vm2000_vm10, %v835_v40  ;;  %v1475_v53 = vpop.eup %1474  ;;  %v1116_v56 = vmul.f32 -1.0, %v1108_v45  ;;  %v1063_v13 = vadd.f32 %v1051_v55, %v1031_v26  ;;  %v1035_v40 = vld [vmem:[#allocation2 + $0x38] sm:$0xff] }
 0x2bb   : > { %v829_v57 = vpop.xlane.xlu1 %828  ;;  %v1477_v58 = vpop.eup %1476  ;;  %v1049_v61 = vmul.f32 0.6931472, %v1475_v53 }
 0x2bc   : > { %v1109_v62 = vsub.f32 %v1095_v52, %v1061_v51  ;;  %v837_v63 = vadd.f32 %v829_v57, %v805_v47  ;;  %v1124_v1 = vsel %vm1068_vm11, %v1116_v56, 0.0  ;;  %v1088_v5 = vld [vmem:[#allocation4 + $0x20] sm:$0xff]  ;;  %v1479_v7 = vpop.eup %1478  ;;  %v1055_v31 = vmul.f32 0.6931472, %v1477_v58  ;;  %vm2002_vm11 = vmmov %vm1994_vm4 }
 0x2bd   : > { %v1087_v6 = vld [vmem:[#allocation4 + $0x18] sm:$0xff]  ;;  %1132 = vst.msk [vmem:[%s1929_s27] sm:$0xff] %vm2001_vm6, %v1124_v1  ;;  %v1062_v8 = vadd.f32 %v1049_v61, %v1030_v0  ;;  %v1101_v10 = vmul.f32 %v1473_v48, %v1088_v5 }
 0x2be   : > { %v1117_v9 = vmul.f32 -1.0, %v1109_v62  ;;  %v1099_v12 = vmul.f32 %v1471_v41, %v1087_v6  ;;  %845 = vst.msk [vmem:[#allocation4 + $0x38] sm:$0xff] %vm1994_vm4, %v837_v63  ;;  %v1481_v25 = vpop.eup %1480  ;;  %v1065_v23 = vadd.f32 %v1055_v31, %v1033_v27 }
 0x2bf   : > { %v1483_v34 = vpop.eup %1482  ;;  %v1057_v11 = vmul.f32 0.6931472, %v1481_v25  ;;  %v1110_v14 = vsub.f32 %v1097_v2, %v1062_v8  ;;  %v1112_v28 = vsub.f32 %v1101_v10, %v1064_v3 }
 0x2c0   : > { %v1125_v15 = vsel %vm1069_vm7, %v1117_v9, 0.0  ;;  %v1111_v16 = vsub.f32 %v1099_v12, %v1063_v13  ;;  %v1090_v17 = vld [vmem:[#allocation4 + $0x30] sm:$0xff]  ;;  %v1485_v18 = vpop.eup %1484  ;;  %vm2003_vm7 = vmmov %vm1994_vm4 }
 0x2c1   : > { %1133 = vst.msk [vmem:[%s1929_s27 + $0x8] sm:$0xff] %vm2002_vm11, %v1125_v15  ;;  %v1089_v4 = vld [vmem:[#allocation4 + $0x28] sm:$0xff]  ;;  %v1118_v30 = vmul.f32 -1.0, %v1110_v14  ;;  %v1120_v32 = vmul.f32 -1.0, %v1112_v28  ;;  %v1066_v19 = vadd.f32 %v1057_v11, %v1034_v29  ;;  %v1105_v20 = vmul.f32 %v1479_v7, %v1090_v17 }
 0x2c2   : > { %v1119_v22 = vmul.f32 -1.0, %v1111_v16  ;;  %v1103_v24 = vmul.f32 %v1483_v34, %v1089_v4 }
 0x2c3   : > { %v1487_v21 = vpop.eup %1486  ;;  %v1126_v36 = vsel %vm1070_vm1, %v1118_v30, 0.0  ;;  %v1128_v37 = vsel %vm1072_vm3, %v1120_v32, 0.0  ;;  %v1114_v39 = vsub.f32 %v1105_v20, %v1066_v19  ;;  %vm2006_vm1 = vmmov %vm1994_vm4 }
 0x2c4   : > { %v1059_v33 = vmul.f32 0.6931472, %v1487_v21  ;;  %1134 = vst.msk [vmem:[%s1929_s27 + $0x10] sm:$0xff] %vm2003_vm7, %v1126_v36  ;;  %v1127_v41 = vsel %vm1071_vm2, %v1119_v22, 0.0  ;;  %v1113_v43 = vsub.f32 %v1103_v24, %v1065_v23  ;;  %vm2007_vm3 = vmmov %vm2006_vm1 }
 0x2c5   : > { %1136 = vst.msk [vmem:[%s1929_s27 + $0x20] sm:$0xff] %vm2004_vm8, %v1128_v37  ;;  %v1091_v44 = vld [vmem:[#allocation4 + $0x38] sm:$0xff]  ;;  %v1122_v35 = vmul.f32 -1.0, %v1114_v39  ;;  %vm2008_vm2 = vmmov %vm2006_vm1 }
 0x2c6   : > { %1135 = vst.msk [vmem:[%s1929_s27 + $0x18] sm:$0xff] %vm2005_vm9, %v1127_v41  ;;  %v1067_v45 = vadd.f32 %v1059_v33, %v1035_v40  ;;  %v1107_v42 = vmul.f32 %v1485_v18, %v1091_v44  ;;  %v1121_v46 = vmul.f32 -1.0, %v1113_v43 }
 0x2c7   : > { %v1130_v47 = vsel %vm1074_vm0, %v1122_v35, 0.0 }
 0x2c8   : > { %v1115_v48 = vsub.f32 %v1107_v42, %v1067_v45  ;;  %1138 = vst.msk [vmem:[%s1929_s27 + $0x30] sm:$0xff] %vm2006_vm1, %v1130_v47  ;;  %v1129_v49 = vsel %vm1073_vm5, %v1121_v46, 0.0 }
 0x2c9   : > { %1137 = vst.msk [vmem:[%s1929_s27 + $0x28] sm:$0xff] %vm2007_vm3, %v1129_v49 }
 0x2ca   : > { %v1123_v38 = vmul.f32 -1.0, %v1115_v48 }
 0x2cc   : > { %v1131_v51 = vsel %vm1075_vm14, %v1123_v38, 0.0 }
 0x2cd   : > { %1139 = vst.msk [vmem:[%s1929_s27 + $0x38] sm:$0xff] %vm2008_vm2, %v1131_v51 }
 0x2ce PF: > { %s15_s20 = sadd.s32 1, %s1510_s20   ;;  %s2009_s18 = smov %s1506_s19 }
 0x2cf   : > { %p12_p5 = scmp.ge.s32.totalorder %s15_s20, 4   ;;  %s2010_s19 = smov %s2012_s21 }
 0x2d1   :  { %14 = sbr.rel (!%p12_p5) target bundleno = 2 (0x2), region = 98 }

</bundles_post_ra>
